<compile_context>
chip_gen: v6e
topology: v6e:2x2x1
jax: 0.10.0
libtpu: 0.0.40
codegen_flags: <defaults>
</compile_context>

<pallas_src>
import jax
import jax.numpy as jnp
from jax import lax
from jax.experimental import pallas as pl
from jax.experimental.pallas import tpu as pltpu


# ---------------------------------------------------------------------------
# Kernel
# ---------------------------------------------------------------------------
def _make_kernel(H, W, Cmid, Cout, nb):
    M = nb * H
    WCmid, WCout = W * Cmid, W * Cout
    HWp = (W // 2) * Cout          # pooled-W lane width (128 for the test sizes)

    def kernel(x_ref, w1s_ref, b1_ref, w2_ref, b2_ref, out_ref, pad_ref):
        # ---- conv1 (+folded BN1) and 1x1 skip, fused into one matmul --------
        # x_ref: (M, 3*W*Cin) bf16, rows in (h, n) order, kh taps stacked on K.
        y1 = jnp.dot(x_ref[...], w1s_ref[...],
                     preferred_element_type=jnp.float32)       # (M, WCmid+WCout)
        h1 = jnp.maximum(y1[:, :WCmid] + b1_ref[...], 0.0)     # fused bias + ReLU
        skip = y1[:, WCmid:]                                    # (M, WCout), permuted cols

        # ---- row-padded intermediate (bf16), rows in (h_pad, n) order -------
        # Borders are re-zeroed every step (two tiny stores) so the kernel is
        # correct even if the grid axis is split across TensorCores.
        zrow = jnp.zeros((nb, WCmid), pad_ref.dtype)
        pad_ref[0:nb, :] = zrow
        pad_ref[(H + 1) * nb:(H + 2) * nb, :] = zrow
        pad_ref[nb:nb + M, :] = h1.astype(pad_ref.dtype)

        # ---- conv2 (+folded BN2): 3 banded matmuls; each tap is a contiguous
        #      static slice of the pad scratch (pure view, no copies). --------
        acc2 = jnp.dot(pad_ref[0:M, :], w2_ref[0],
                       preferred_element_type=jnp.float32)
        for kh in (1, 2):
            acc2 = acc2 + jnp.dot(pad_ref[kh * nb:kh * nb + M, :], w2_ref[kh],
                                  preferred_element_type=jnp.float32)
        y = jnp.maximum(acc2 + b2_ref[...], 0.0) + skip         # (M, WCout)

        # ---- 2x2 max pool: W via the 128-aligned (even-j | odd-j) halves,
        #      H via adjacent row pairs (rows h*nb+n and (h+1)*nb+n). ---------
        wp = jnp.maximum(y[:, :HWp], y[:, HWp:])                # (M, HWp)
        v = wp.reshape(H // 2, 2 * nb, HWp)
        out_ref[...] = jnp.maximum(v[:, :nb, :], v[:, nb:, :]).reshape(
            (H // 2) * nb, HWp)

    return kernel


# ---------------------------------------------------------------------------
# One-time weight preparation (hoisted out of the forward path)
# ---------------------------------------------------------------------------
def _fold_bn(w, b, gamma, beta, mean, var, eps):
    s = gamma / jnp.sqrt(var + eps)
    return w * s, b * s + beta - mean * s


def _banded_conv_mats(w, Wdim, col_order=None):
    """w: (3, 3, Ci, Co) -> (3, Wdim*Ci, Wdim*Co) block-Toeplitz matrices.

    B[kh, ji*Ci + c, j*Co + o] = sum_kw [ji == j+kw-1] * w[kh, kw, c, o]
    (out-of-range kw taps are absent -> zero padding along W is built in).
    Optional output-column (j-block) permutation."""
    KH, KW, Ci, Co = w.shape
    ji = jnp.arange(Wdim)
    j = jnp.arange(Wdim)
    kw = jnp.arange(KW)
    sel = (ji[None, :, None] == j[None, None, :] + kw[:, None, None] - 1)
    sel = sel.astype(w.dtype)                                   # (KW, W, W)
    B = jnp.einsum('kij,hkco->hicjo', sel, w)                   # (KH, W, Ci, W, Co)
    if col_order is not None:
        B = B[:, :, :, col_order, :]
    return B.reshape(KH, Wdim * Ci, Wdim * Co)


def _banded_skip_mat(wskip, Wdim, col_order):
    """wskip: (Ci, Co) -> block-diagonal (Wdim*Ci, Wdim*Co) with permuted cols."""
    B = jnp.einsum('ij,co->icjo', jnp.eye(Wdim, dtype=wskip.dtype), wskip)
    B = B[:, :, col_order, :]
    return B.reshape(Wdim * wskip.shape[0], Wdim * wskip.shape[1])


def prepare_simple_res_block(params, H, W, eps=1e-5, compute_dtype=jnp.bfloat16):
    """Build the (constant) kernel weights once; call this outside the hot path."""
    Cin = params["w1"].shape[2]
    Cmid = params["w1"].shape[3]
    Cout = params["w2"].shape[3]

    w1f, b1f = _fold_bn(params["w1"], params["b1"], params["gamma1"],
                        params["beta1"], params["mean1"], params["var1"], eps)
    w2f, b2f = _fold_bn(params["w2"], params["b2"], params["gamma2"],
                        params["beta2"], params["mean2"], params["var2"], eps)
    wskip = params.get("wskip")
    if wskip is None:                       # in_c == out_c -> identity skip
        wskip = jnp.eye(Cin, dtype=jnp.float32)

    # conv2/skip output columns in (even-j | odd-j) order -> 128-aligned W-pool.
    pool_order = jnp.concatenate([jnp.arange(0, W, 2), jnp.arange(1, W, 2)])

    B1 = _banded_conv_mats(w1f.astype(jnp.float32), W)               # (3, W*Cin, W*Cmid)
    Bs = _banded_skip_mat(wskip.astype(jnp.float32), W, pool_order)  # (W*Cin, W*Cout)
    Bs3 = jnp.zeros((3, W * Cin, W * Cout), jnp.float32).at[1].set(Bs)
    # Fused conv1+skip weight: K = 3*W*Cin (kh taps stacked), N = W*(Cmid+Cout).
    W1S = jnp.concatenate([B1, Bs3], axis=-1).reshape(3 * W * Cin,
                                                      W * (Cmid + Cout))
    B2 = _banded_conv_mats(w2f.astype(jnp.float32), W, pool_order)   # (3, W*Cmid, W*Cout)

    return {
        "W1S": W1S.astype(compute_dtype),
        "B2": B2.astype(compute_dtype),
        "b1": jnp.tile(b1f.astype(jnp.float32), W)[None, :],    # (1, W*Cmid)
        "b2": jnp.tile(b2f.astype(jnp.float32), W)[None, :],    # (1, W*Cout)
    }


# ---------------------------------------------------------------------------
# Forward pass
# ---------------------------------------------------------------------------
def _choose_nb(N, H):
    # Fold batch so M = nb*H fills the MXU rows (>=256 when possible) and the
    # per-grid-step overhead is amortized; cap nb so VMEM residency stays well
    # under the scoped limit (v7x has only 64 MiB physical VMEM).
    cap = min(N, 128)
    return max(d for d in range(1, cap + 1) if N % d == 0)


def simple_res_block(x_nchw, prep, compute_dtype=jnp.bfloat16):
    """SimpleResBlock forward.  `prep` comes from prepare_simple_res_block.
    Input/output are NCHW like PyTorch."""
    N, Cin, H, W = x_nchw.shape
    assert H % 2 == 0 and W % 2 == 0, "2x2 max-pool requires even H and W"
    WCmid = prep["b1"].shape[1]
    WCout = prep["b2"].shape[1]
    Cmid, Cout = WCmid // W, WCout // W
    K1 = 3 * W * Cin
    HWp = (W // 2) * Cout

    nb = _choose_nb(N, H)
    steps = N // nb
    M = nb * H

    # im2col of the (tiny) input: per batch chunk, rows in (h, n) order so all
    # kernel-side views are contiguous; cast to bf16 for the MXU.
    xf = jnp.transpose(x_nchw, (0, 2, 3, 1)).astype(jnp.float32).reshape(N, H, W * Cin)
    xfp = jnp.pad(xf, ((0, 0), (1, 1), (0, 0)))
    xim = jnp.concatenate([xfp[:, 0:H], xfp[:, 1:H + 1], xfp[:, 2:H + 2]], axis=-1)
    xim = xim.reshape(steps, nb, H, K1).transpose(0, 2, 1, 3).reshape(steps * M, K1)
    xim = xim.astype(compute_dtype)

    kernel = _make_kernel(H, W, Cmid, Cout, nb)

    grid_spec = pltpu.PrefetchScalarGridSpec(
        num_scalar_prefetch=0,
        grid=(steps,),
        in_specs=[
            pl.BlockSpec((M, K1), lambda s: (s, 0)),                 # im2col'd x (bf16)
            pl.BlockSpec((K1, WCmid + WCout), lambda s: (0, 0)),     # fused conv1+skip W
            pl.BlockSpec((1, WCmid), lambda s: (0, 0)),              # bias1 (f32)
            pl.BlockSpec((3, WCmid, WCout), lambda s: (0, 0, 0)),    # banded conv2 W
            pl.BlockSpec((1, WCout), lambda s: (0, 0)),              # bias2 (f32)
        ],
        out_specs=pl.BlockSpec(((H // 2) * nb, HWp), lambda s: (s, 0)),
        scratch_shapes=[pltpu.VMEM(((H + 2) * nb, WCmid), compute_dtype)],
    )

    # Only shard the grid across TensorCores when each step has enough MXU rows.
    parallel = steps > 1 and M >= 128
    out_flat = pl.pallas_call(
        kernel,
        out_shape=jax.ShapeDtypeStruct((steps * (H // 2) * nb, HWp), jnp.float32),
        grid_spec=grid_spec,
        compiler_params=pltpu.CompilerParams(
            dimension_semantics=("parallel" if parallel else "arbitrary",)),
    )(xim, prep["W1S"], prep["b1"], prep["B2"], prep["b2"])

    # rows = (step, h_pooled, n_local), cols = (w_pooled, cout)  ->  NCHW
    out = out_flat.reshape(steps, H // 2, nb, W // 2, Cout)
    out = jnp.transpose(out, (0, 2, 4, 1, 3)).reshape(N, Cout, H // 2, W // 2)
    return out


# ---------------------------------------------------------------------------
# Pure-JAX reference (inference-mode BN) for correctness checking
# ---------------------------------------------------------------------------
def ref_forward(x_nchw, params, eps=1e-5):
    dn = ("NHWC", "HWIO", "NHWC")
    x = jnp.transpose(x_nchw, (0, 2, 3, 1)).astype(jnp.float32)
    s1 = params["gamma1"] / jnp.sqrt(params["var1"] + eps)
    t1 = params["beta1"] - params["mean1"] * s1
    s2 = params["gamma2"] / jnp.sqrt(params["var2"] + eps)
    t2 = params["beta2"] - params["mean2"] * s2

    h = lax.conv_general_dilated(x, params["w1"], (1, 1), [(1, 1), (1, 1)],
                                 dimension_numbers=dn) + params["b1"]
    h = jnp.maximum(h * s1 + t1, 0.0)
    h = lax.conv_general_dilated(h, params["w2"], (1, 1), [(1, 1), (1, 1)],
                                 dimension_numbers=dn) + params["b2"]
    h = jnp.maximum(h * s2 + t2, 0.0)
    ident = lax.conv_general_dilated(x, params["wskip"][None, None], (1, 1),
                                     [(0, 0), (0, 0)], dimension_numbers=dn)
    y = h + ident
    p = lax.reduce_window(y, -jnp.inf, lax.max,
                          (1, 2, 2, 1), (1, 2, 2, 1), "VALID")
    return jnp.transpose(p, (0, 3, 1, 2))


def init_params(key, in_c, mid_c, out_c):
    ks = jax.random.split(key, 12)
    p = {
        "w1": 0.1 * jax.random.normal(ks[0], (3, 3, in_c, mid_c), jnp.float32),
        "b1": 0.1 * jax.random.normal(ks[1], (mid_c,), jnp.float32),
        "gamma1": 1.0 + 0.1 * jax.random.normal(ks[2], (mid_c,), jnp.float32),
        "beta1": 0.1 * jax.random.normal(ks[3], (mid_c,), jnp.float32),
        "mean1": 0.1 * jax.random.normal(ks[4], (mid_c,), jnp.float32),
        "var1": 0.5 + jnp.abs(jax.random.normal(ks[5], (mid_c,), jnp.float32)),
        "w2": 0.1 * jax.random.normal(ks[6], (3, 3, mid_c, out_c), jnp.float32),
        "b2": 0.1 * jax.random.normal(ks[7], (out_c,), jnp.float32),
        "gamma2": 1.0 + 0.1 * jax.random.normal(ks[8], (out_c,), jnp.float32),
        "beta2": 0.1 * jax.random.normal(ks[9], (out_c,), jnp.float32),
        "mean2": 0.1 * jax.random.normal(ks[10], (out_c,), jnp.float32),
        "var2": 0.5 + jnp.abs(jax.random.normal(ks[11], (out_c,), jnp.float32)),
        # in_c != out_c -> 1x1 skip conv (no bias), like the PyTorch module
        "wskip": 0.1 * jax.random.normal(jax.random.fold_in(key, 99),
                                         (in_c, out_c), jnp.float32),
    }
    return p


if __name__ == "__main__":
    # TODO(synk): BatchNorm is implemented in inference mode (running stats);
    # PyTorch training-mode batch statistics are not reproduced.
    N, in_c, mid_c, out_c, H, W = 2, 4, 8, 16, 16, 16

    key = jax.random.PRNGKey(0)
    kx, kp = jax.random.split(key)
    x = jax.random.normal(kx, (N, in_c, H, W), jnp.float32)   # NCHW like PyTorch
    params = init_params(kp, in_c, mid_c, out_c)

    prep = prepare_simple_res_block(params, H, W)             # one-time, hoisted
    fwd = jax.jit(simple_res_block)
    out = jax.block_until_ready(fwd(x, prep))

    ref = ref_forward(x, params)
    assert out.shape == (N, out_c, H // 2, W // 2), out.shape
    # bf16 MXU operands (f32 accumulate) -> relaxed tolerance vs the f32 reference.
    assert jnp.allclose(out, ref, rtol=2e-2, atol=2e-2), \
        float(jnp.max(jnp.abs(out - ref)))

    print("KERNEL_OK")
</pallas_src>

<mosaic_0001>
module attributes {stable_mosaic.version = 11 : i64} {
  func.func @kernel(%arg0: i32, %arg1: memref<32x192xbf16, #tpu.memory_space<vmem>>, %arg2: memref<192x384xbf16, #tpu.memory_space<vmem>>, %arg3: memref<1x128xf32, #tpu.memory_space<vmem>>, %arg4: memref<3x128x256xbf16, #tpu.memory_space<vmem>>, %arg5: memref<1x256xf32, #tpu.memory_space<vmem>>, %arg6: memref<16x128xf32, #tpu.memory_space<vmem>>, %arg7: memref<36x128xbf16, #tpu.memory_space<vmem>>) attributes {dimension_semantics = [#tpu.dimension_semantics<arbitrary>], iteration_bounds = array<i64: 1>, scalar_prefetch = 0 : i64, scratch_operands = 1 : i64, tpu.core_type = #tpu.core_type<tc>, window_params = [{transform_indices = @transform_0, window_bounds = array<i64: 32, 192>}, {pipeline_mode = #tpu.pipeline_mode<synchronous>, transform_indices = @transform_1, window_bounds = array<i64: 192, 384>}, {pipeline_mode = #tpu.pipeline_mode<synchronous>, transform_indices = @transform_2, window_bounds = array<i64: 1, 128>}, {pipeline_mode = #tpu.pipeline_mode<synchronous>, transform_indices = @transform_3, window_bounds = array<i64: 3, 128, 256>}, {pipeline_mode = #tpu.pipeline_mode<synchronous>, transform_indices = @transform_4, window_bounds = array<i64: 1, 256>}, {transform_indices = @transform_5, window_bounds = array<i64: 16, 128>}]} {
    %c0 = arith.constant 0 : index
    %c0_0 = arith.constant 0 : index
    %0 = vector.load %arg1[%c0, %c0_0] : memref<32x192xbf16, #tpu.memory_space<vmem>>, vector<32x192xbf16>
    %c0_1 = arith.constant 0 : index
    %c0_2 = arith.constant 0 : index
    %1 = vector.load %arg2[%c0_1, %c0_2] : memref<192x384xbf16, #tpu.memory_space<vmem>>, vector<192x384xbf16>
    %cst = arith.constant dense<0.000000e+00> : vector<32x384xf32>
    %2 = tpu.matmul %0, %1, %cst {dimension_numbers = #tpu.dot_dimension_numbers<[1], [0], [0], [1], [0, 0, 1, 1], [], []>} : vector<32x192xbf16>, vector<192x384xbf16>, vector<32x384xf32> -> vector<32x384xf32>
    %3 = vector.extract_strided_slice %2 {offsets = [0, 0], sizes = [32, 128], strides = [1, 1]} : vector<32x384xf32> to vector<32x128xf32>
    %c0_3 = arith.constant 0 : index
    %c0_4 = arith.constant 0 : index
    %4 = vector.load %arg3[%c0_3, %c0_4] : memref<1x128xf32, #tpu.memory_space<vmem>>, vector<1x128xf32>
    %5 = vector.broadcast %4 : vector<1x128xf32> to vector<32x128xf32>
    %6 = arith.addf %3, %5 : vector<32x128xf32>
    %cst_5 = arith.constant 0.000000e+00 : f32
    %7 = vector.broadcast %cst_5 : f32 to vector<32x128xf32>
    %8 = arith.maximumf %6, %7 : vector<32x128xf32>
    %9 = vector.extract_strided_slice %2 {offsets = [0, 128], sizes = [32, 256], strides = [1, 1]} : vector<32x384xf32> to vector<32x256xf32>
    %cst_6 = arith.constant 0.000000e+00 : bf16
    %10 = vector.broadcast %cst_6 : bf16 to vector<2x128xbf16>
    %c0_7 = arith.constant 0 : index
    %c0_8 = arith.constant 0 : index
    %11 = vector.load %arg7[%c0_7, %c0_8] : memref<36x128xbf16, #tpu.memory_space<vmem>>, vector<2x128xbf16>
    tpu.vector_store %arg7[%c0_7, %c0_8], %10 {strides = array<i32>} : memref<36x128xbf16, #tpu.memory_space<vmem>>, vector<2x128xbf16>,
    %c34 = arith.constant 34 : index
    %c0_9 = arith.constant 0 : index
    %12 = vector.load %arg7[%c34, %c0_9] : memref<36x128xbf16, #tpu.memory_space<vmem>>, vector<2x128xbf16>
    tpu.vector_store %arg7[%c34, %c0_9], %10 {strides = array<i32>} : memref<36x128xbf16, #tpu.memory_space<vmem>>, vector<2x128xbf16>,
    %13 = arith.truncf %8 : vector<32x128xf32> to vector<32x128xbf16>
    %c2 = arith.constant 2 : index
    %c0_10 = arith.constant 0 : index
    %14 = vector.load %arg7[%c2, %c0_10] : memref<36x128xbf16, #tpu.memory_space<vmem>>, vector<32x128xbf16>
    tpu.vector_store %arg7[%c2, %c0_10], %13 {strides = array<i32>} : memref<36x128xbf16, #tpu.memory_space<vmem>>, vector<32x128xbf16>,
    %c0_11 = arith.constant 0 : index
    %c0_12 = arith.constant 0 : index
    %15 = vector.load %arg7[%c0_11, %c0_12] : memref<36x128xbf16, #tpu.memory_space<vmem>>, vector<32x128xbf16>
    %c0_13 = arith.constant 0 : index
    %c0_14 = arith.constant 0 : index
    %c0_15 = arith.constant 0 : index
    %16 = vector.load %arg4[%c0_13, %c0_14, %c0_15] : memref<3x128x256xbf16, #tpu.memory_space<vmem>>, vector<1x128x256xbf16>
    %17 = vector.shape_cast %16 : vector<1x128x256xbf16> to vector<128x256xbf16>
    %cst_16 = arith.constant dense<0.000000e+00> : vector<32x256xf32>
    %18 = tpu.matmul %15, %17, %cst_16 {dimension_numbers = #tpu.dot_dimension_numbers<[1], [0], [0], [1], [0, 0, 1, 1], [], []>} : vector<32x128xbf16>, vector<128x256xbf16>, vector<32x256xf32> -> vector<32x256xf32>
    %c2_17 = arith.constant 2 : index
    %c0_18 = arith.constant 0 : index
    %19 = vector.load %arg7[%c2_17, %c0_18] : memref<36x128xbf16, #tpu.memory_space<vmem>>, vector<32x128xbf16>
    %c1 = arith.constant 1 : index
    %c0_19 = arith.constant 0 : index
    %c0_20 = arith.constant 0 : index
    %20 = vector.load %arg4[%c1, %c0_19, %c0_20] : memref<3x128x256xbf16, #tpu.memory_space<vmem>>, vector<1x128x256xbf16>
    %21 = vector.shape_cast %20 : vector<1x128x256xbf16> to vector<128x256xbf16>
    %cst_21 = arith.constant dense<0.000000e+00> : vector<32x256xf32>
    %22 = tpu.matmul %19, %21, %cst_21 {dimension_numbers = #tpu.dot_dimension_numbers<[1], [0], [0], [1], [0, 0, 1, 1], [], []>} : vector<32x128xbf16>, vector<128x256xbf16>, vector<32x256xf32> -> vector<32x256xf32>
    %23 = arith.addf %18, %22 : vector<32x256xf32>
    %c4 = arith.constant 4 : index
    %c0_22 = arith.constant 0 : index
    %24 = vector.load %arg7[%c4, %c0_22] : memref<36x128xbf16, #tpu.memory_space<vmem>>, vector<32x128xbf16>
    %c2_23 = arith.constant 2 : index
    %c0_24 = arith.constant 0 : index
    %c0_25 = arith.constant 0 : index
    %25 = vector.load %arg4[%c2_23, %c0_24, %c0_25] : memref<3x128x256xbf16, #tpu.memory_space<vmem>>, vector<1x128x256xbf16>
    %26 = vector.shape_cast %25 : vector<1x128x256xbf16> to vector<128x256xbf16>
    %cst_26 = arith.constant dense<0.000000e+00> : vector<32x256xf32>
    %27 = tpu.matmul %24, %26, %cst_26 {dimension_numbers = #tpu.dot_dimension_numbers<[1], [0], [0], [1], [0, 0, 1, 1], [], []>} : vector<32x128xbf16>, vector<128x256xbf16>, vector<32x256xf32> -> vector<32x256xf32>
    %28 = arith.addf %23, %27 : vector<32x256xf32>
    %c0_27 = arith.constant 0 : index
    %c0_28 = arith.constant 0 : index
    %29 = vector.load %arg5[%c0_27, %c0_28] : memref<1x256xf32, #tpu.memory_space<vmem>>, vector<1x256xf32>
    %30 = vector.broadcast %29 : vector<1x256xf32> to vector<32x256xf32>
    %31 = arith.addf %28, %30 : vector<32x256xf32>
    %cst_29 = arith.constant 0.000000e+00 : f32
    %32 = vector.broadcast %cst_29 : f32 to vector<32x256xf32>
    %33 = arith.maximumf %31, %32 : vector<32x256xf32>
    %34 = arith.addf %33, %9 : vector<32x256xf32>
    %35 = vector.extract_strided_slice %34 {offsets = [0, 0], sizes = [32, 128], strides = [1, 1]} : vector<32x256xf32> to vector<32x128xf32>
    %36 = vector.extract_strided_slice %34 {offsets = [0, 128], sizes = [32, 128], strides = [1, 1]} : vector<32x256xf32> to vector<32x128xf32>
    %37 = arith.maximumf %35, %36 : vector<32x128xf32>
    %38 = vector.shape_cast %37 : vector<32x128xf32> to vector<8x4x128xf32>
    %39 = vector.extract_strided_slice %38 {offsets = [0, 0, 0], sizes = [8, 2, 128], strides = [1, 1, 1]} : vector<8x4x128xf32> to vector<8x2x128xf32>
    %40 = vector.extract_strided_slice %38 {offsets = [0, 2, 0], sizes = [8, 2, 128], strides = [1, 1, 1]} : vector<8x4x128xf32> to vector<8x2x128xf32>
    %41 = arith.maximumf %39, %40 : vector<8x2x128xf32>
    %42 = vector.shape_cast %41 : vector<8x2x128xf32> to vector<16x128xf32>
    %c0_30 = arith.constant 0 : index
    %c0_31 = arith.constant 0 : index
    %43 = vector.load %arg6[%c0_30, %c0_31] : memref<16x128xf32, #tpu.memory_space<vmem>>, vector<16x128xf32>
    tpu.vector_store %arg6[%c0_30, %c0_31], %42 {strides = array<i32>} : memref<16x128xf32, #tpu.memory_space<vmem>>, vector<16x128xf32>,
    return
  }
  func.func @transform_0(%arg0: i32) -> (i32, i32) {
    %c0_i32 = arith.constant 0 : i32
    %c0_i32_0 = arith.constant 0 : i32
    return %arg0, %c0_i32 : i32, i32
  }
  func.func @transform_1(%arg0: i32) -> (i32, i32) {
    %c0_i32 = arith.constant 0 : i32
    %c0_i32_0 = arith.constant 0 : i32
    %c0_i32_1 = arith.constant 0 : i32
    return %c0_i32, %c0_i32_0 : i32, i32
  }
  func.func @transform_2(%arg0: i32) -> (i32, i32) {
    %c0_i32 = arith.constant 0 : i32
    %c0_i32_0 = arith.constant 0 : i32
    %c0_i32_1 = arith.constant 0 : i32
    return %c0_i32, %c0_i32_0 : i32, i32
  }
  func.func @transform_3(%arg0: i32) -> (i32, i32, i32) {
    %c0_i32 = arith.constant 0 : i32
    %c0_i32_0 = arith.constant 0 : i32
    %c0_i32_1 = arith.constant 0 : i32
    %c0_i32_2 = arith.constant 0 : i32
    return %c0_i32, %c0_i32_0, %c0_i32_1 : i32, i32, i32
  }
  func.func @transform_4(%arg0: i32) -> (i32, i32) {
    %c0_i32 = arith.constant 0 : i32
    %c0_i32_0 = arith.constant 0 : i32
    %c0_i32_1 = arith.constant 0 : i32
    return %c0_i32, %c0_i32_0 : i32, i32
  }
  func.func @transform_5(%arg0: i32) -> (i32, i32) {
    %c0_i32 = arith.constant 0 : i32
    %c0_i32_0 = arith.constant 0 : i32
    return %arg0, %c0_i32 : i32, i32
  }
}

</mosaic_0001>

<bundles_post_ra>
// kernel: simple_res_block.1
= control target key start
LH: loop header
LB: loop body
LE: loop exit
PB: predicated region body
PF: predicated region fallthrough
CT: control target
= control target key end

     0   :  { %v1381_v1 = vmov 0   ;;  %vm283_vm0 = vcmask 523264   ;;  %vm421_vm1 = vcmask 1040384   ;;  %vm422_vm2 = vcmask 1044484   ;;  %s1760_s1 = inlined_call_operand.vmem [shape: bf16[192,384], index: 1, kind: input, shape index: {}]   ;;  %s1761_s0 = inlined_call_operand.vmem [shape: bf16[32,192], index: 0, kind: input, shape index: {}]   ;;  %s1762_s3 = inlined_call_operand.vmem [shape: bf16[3,128,256], index: 3, kind: input, shape index: {}]   ;;  %s1763_s2 = inlined_call_operand.vmem [shape: f32[1,128], index: 2, kind: input, shape index: {}]   ;;  %s1764_s4 = inlined_call_operand.vmem [shape: f32[1,256], index: 4, kind: input, shape index: {}]   ;;  %s1765_s5 = inlined_call_operand.vmem [shape: f32[16,128], index: 5, kind: output, shape index: {}]  }
   0x1   :  { %v1249_v0 = vld [vmem:[%s1760_s1 + $0xac] ss:$12 sps:$4 sm:$0xff]   ;;  %343 = vmatprep.subr.bf16.mxu1 %v1381_v1  ;;  %407 = vst [vmem:[#allocation2] sm:$0x1] %v1381_v1  ;;  %v1251_v2 = vld [vmem:[%s1760_s1 + $0xa8] ss:$12 sps:$4 sm:$0xff]   ;;  %vm1658_vm3 = vmor %vm421_vm1, %vm422_vm2 }
   0x2   :  { %290 = vmatprep.subr.bf16.mxu0 %v1249_v0  ;;  %v1252_v3 = vld [vmem:[%s1760_s1 + $0x94] ss:$12 sps:$4 sm:$0xff]   ;;  %v1254_v4 = vld [vmem:[%s1760_s1 + $0x90] ss:$12 sps:$4 sm:$0xff]   ;;  %v1257_v6 = vld [vmem:[%s1760_s1 + $0x78] ss:$12 sps:$4 sm:$0xff]  }
   0x3   :  { %291 = vmatpush1.bf16.msra.mxu0 %v1251_v2  ;;  %v1255_v5 = vld [vmem:[%s1760_s1 + $0x7c] ss:$12 sps:$4 sm:$0xff]   ;;  %v1258_v7 = vld [vmem:[%s1760_s1 + $0x64] ss:$12 sps:$4 sm:$0xff]   ;;  %v1260_v8 = vld [vmem:[%s1760_s1 + $0x60] ss:$12 sps:$4 sm:$0xff]  }
   0x4   :  { %292 = vmatprep.subr.bf16.mxu0 %v1252_v3  ;;  %v1261_v9 = vld [vmem:[%s1760_s1 + $0x4c] ss:$12 sps:$4 sm:$0xff]   ;;  %v1263_v10 = vld [vmem:[%s1760_s1 + $0x48] ss:$12 sps:$4 sm:$0xff]   ;;  %v1266_v13 = vld [vmem:[%s1760_s1 + $0x30] ss:$12 sps:$4 sm:$0xff]  }
   0x5   :  { %v1264_v11 = vld [vmem:[%s1760_s1 + $0x34] ss:$12 sps:$4 sm:$0xff]   ;;  %v1287_v12 = vld [vmem:[%s1761_s0 + $0x4] ss:$8 sps:$4 sm:$0xff]   ;;  %v1291_v14 = vld [vmem:[%s1760_s1 + $0xb0] ss:$12 sps:$4 sm:$0xff]  }
   0x6   :  { %1124 = vmatprep.mubr.msk.bf16.mxu0 %vm283_vm0, %v1287_v12  ;;  %v1267_v15 = vld [vmem:[%s1760_s1 + $0x1c] ss:$12 sps:$4 sm:$0xff]   ;;  %1126 = vmatprep.mubr.msk.bf16.mxu1 %vm283_vm0, %v1287_v12  ;;  %v1292_v16 = vld [vmem:[%s1760_s1 + $0x98] ss:$12 sps:$4 sm:$0xff]   ;;  %v1293_v19 = vld [vmem:[%s1760_s1 + $0x80] ss:$12 sps:$4 sm:$0xff]  }
   0x7   :  { %293 = vmatpush1.bf16.msra.mxu0 %v1254_v4  ;;  %344 = vmatpush1.bf16.msra.mxu1 %v1291_v14  ;;  %v1269_v17 = vld [vmem:[%s1760_s1 + $0x18] ss:$12 sps:$4 sm:$0xff]   ;;  %v1272_v20 = vld [vmem:[%s1760_s1] ss:$12 sps:$4 sm:$0xff]   ;;  %v1294_v22 = vld [vmem:[%s1760_s1 + $0x68] ss:$12 sps:$4 sm:$0xff]  }
   0x8   :  { %294 = vmatprep.subr.bf16.mxu0 %v1255_v5  ;;  %345 = vmatprep.subr.bf16.mxu1 %v1381_v1  ;;  %v1270_v18 = vld [vmem:[%s1760_s1 + $0x4] ss:$12 sps:$4 sm:$0xff]   ;;  %v1273_v21 = vld [vmem:[%s1760_s1 + $0x10c] ss:$12 sps:$4 sm:$0xff]   ;;  %v1275_v23 = vld [vmem:[%s1760_s1 + $0x108] ss:$12 sps:$4 sm:$0xff]  }
   0x9   :  { %v1276_v24 = vld [vmem:[%s1760_s1 + $0xf4] ss:$12 sps:$4 sm:$0xff]   ;;  %v1295_v25 = vld [vmem:[%s1760_s1 + $0x50] ss:$12 sps:$4 sm:$0xff]   ;;  %v1296_v28 = vld [vmem:[%s1760_s1 + $0x38] ss:$12 sps:$4 sm:$0xff]  }
   0xa   :  { %v1278_v26 = vld [vmem:[%s1760_s1 + $0xf0] ss:$12 sps:$4 sm:$0xff]   ;;  %v1281_v29 = vld [vmem:[%s1760_s1 + $0xd8] ss:$12 sps:$4 sm:$0xff]   ;;  %v1297_v31 = vld [vmem:[%s1760_s1 + $0x20] ss:$12 sps:$4 sm:$0xff]  }
   0xb   :  { %295 = vmatpush1.bf16.msra.mxu0 %v1257_v6  ;;  %346 = vmatpush1.bf16.msra.mxu1 %v1292_v16  ;;  %v1279_v27 = vld [vmem:[%s1760_s1 + $0xdc] ss:$12 sps:$4 sm:$0xff]   ;;  %v1282_v30 = vld [vmem:[%s1760_s1 + $0xc4] ss:$12 sps:$4 sm:$0xff]   ;;  %v1284_v32 = vld [vmem:[%s1760_s1 + $0xc0] ss:$12 sps:$4 sm:$0xff]  }
   0xc   :  { %296 = vmatprep.subr.bf16.mxu0 %v1258_v7  ;;  %347 = vmatprep.subr.bf16.mxu1 %v1381_v1  ;;  %v1298_v33 = vld [vmem:[%s1760_s1 + $0x8] ss:$12 sps:$4 sm:$0xff]   ;;  %v1299_v36 = vld [vmem:[%s1760_s1 + $0x110] ss:$12 sps:$4 sm:$0xff]   ;;  %v1300_v37 = vld [vmem:[%s1760_s1 + $0xf8] ss:$12 sps:$4 sm:$0xff]  }
   0xd   :  { %v1285_v34 = vld [vmem:[%s1761_s0] ss:$8 sps:$4 sm:$0xff]   ;;  %v1288_v35 = vld [vmem:[%s1761_s0 + $0x14] ss:$8 sps:$4 sm:$0xff]   ;;  %v1290_v38 = vld [vmem:[%s1761_s0 + $0x10] ss:$8 sps:$4 sm:$0xff]  }
   0xe   :  { %v1301_v39 = vld [vmem:[%s1760_s1 + $0xe0] ss:$12 sps:$4 sm:$0xff]   ;;  %v1302_v40 = vld [vmem:[%s1760_s1 + $0xc8] ss:$12 sps:$4 sm:$0xff]   ;;  %v1303_v42 = vld [vmem:[%s1762_s3 + $0x70] ss:$8 sps:$4 sm:$0xff]  }
   0xf   :  { %297 = vmatpush1.bf16.msra.mxu0 %v1260_v8  ;;  %348 = vmatpush1.bf16.msra.mxu1 %v1293_v19  ;;  %v1305_v41 = vld [vmem:[%s1762_s3 + $0x74] ss:$8 sps:$4 sm:$0xff]   ;;  %v1308_v43 = vld [vmem:[%s1762_s3 + $0x64] ss:$8 sps:$4 sm:$0xff]   ;;  %v1306_v44 = vld [vmem:[%s1762_s3 + $0x60] ss:$8 sps:$4 sm:$0xff]  }
  0x10   :  { %298 = vmatprep.subr.bf16.mxu0 %v1261_v9  ;;  %349 = vmatprep.subr.bf16.mxu1 %v1381_v1  ;;  %v1311_v45 = vld [vmem:[%s1762_s3 + $0x54] ss:$8 sps:$4 sm:$0xff]   ;;  %v1309_v46 = vld [vmem:[%s1762_s3 + $0x50] ss:$8 sps:$4 sm:$0xff]   ;;  %v1317_v49 = vld [vmem:[%s1762_s3 + $0x44] ss:$8 sps:$4 sm:$0xff]  }
  0x11   :  { %v1314_v47 = vld [vmem:[%s1762_s3 + $0xf4] ss:$8 sps:$4 sm:$0xff]   ;;  %v1312_v48 = vld [vmem:[%s1762_s3 + $0xf0] ss:$8 sps:$4 sm:$0xff]   ;;  %v1315_v50 = vld [vmem:[%s1762_s3 + $0x40] ss:$8 sps:$4 sm:$0xff]  }
  0x12   :  { %v1320_v51 = vld [vmem:[%s1762_s3 + $0xe4] ss:$8 sps:$4 sm:$0xff]   ;;  %v1318_v52 = vld [vmem:[%s1762_s3 + $0xe0] ss:$8 sps:$4 sm:$0xff]   ;;  %v1323_v53 = vld [vmem:[%s1762_s3 + $0x34] ss:$8 sps:$4 sm:$0xff]  }
  0x13   :  { %299 = vmatpush1.bf16.msra.mxu0 %v1263_v10  ;;  %350 = vmatpush1.bf16.msra.mxu1 %v1294_v22  ;;  %v1321_v54 = vld [vmem:[%s1762_s3 + $0x30] ss:$8 sps:$4 sm:$0xff]   ;;  %v1326_v55 = vld [vmem:[%s1762_s3 + $0xd4] ss:$8 sps:$4 sm:$0xff]   ;;  %v1329_v57 = vld [vmem:[%s1762_s3 + $0x24] ss:$8 sps:$4 sm:$0xff]  }
  0x14   :  { %300 = vmatprep.subr.bf16.mxu0 %v1264_v11  ;;  %351 = vmatprep.subr.bf16.mxu1 %v1381_v1  ;;  %v1324_v56 = vld [vmem:[%s1762_s3 + $0xd0] ss:$8 sps:$4 sm:$0xff]   ;;  %v1327_v58 = vld [vmem:[%s1762_s3 + $0x20] ss:$8 sps:$4 sm:$0xff]   ;;  %v1332_v59 = vld [vmem:[%s1762_s3 + $0xc4] ss:$8 sps:$4 sm:$0xff]  }
  0x15   :  { %v1330_v60 = vld [vmem:[%s1762_s3 + $0xc0] ss:$8 sps:$4 sm:$0xff]   ;;  %v1335_v61 = vld [vmem:[%s1762_s3 + $0x14] ss:$8 sps:$4 sm:$0xff]   ;;  %v1333_v62 = vld [vmem:[%s1762_s3 + $0x10] ss:$8 sps:$4 sm:$0xff]  }
  0x16   :  { %v1338_v63 = vld [vmem:[%s1762_s3 + $0xb4] ss:$8 sps:$4 sm:$0xff]   ;;  %v1336_v0 = vld [vmem:[%s1762_s3 + $0xb0] ss:$8 sps:$4 sm:$0xff]   ;;  %v1341_v2 = vld [vmem:[%s1762_s3 + $0x4] ss:$8 sps:$4 sm:$0xff]  }
  0x17   :  { %301 = vmatpush1.bf16.msra.mxu0 %v1266_v13  ;;  %352 = vmatpush1.bf16.msra.mxu1 %v1295_v25  ;;  %v1339_v3 = vld [vmem:[%s1762_s3] ss:$8 sps:$4 sm:$0xff]   ;;  %v1344_v4 = vld [vmem:[%s1762_s3 + $0xa4] ss:$8 sps:$4 sm:$0xff]   ;;  %v1347_v6 = vld [vmem:[%s1762_s3 + $0x174] ss:$8 sps:$4 sm:$0xff]  }
  0x18   :  { %302 = vmatprep.subr.bf16.mxu0 %v1267_v15  ;;  %353 = vmatprep.subr.bf16.mxu1 %v1381_v1  ;;  %v1342_v5 = vld [vmem:[%s1762_s3 + $0xa0] ss:$8 sps:$4 sm:$0xff]   ;;  %v1351_v7 = vld [vmem:[%s1762_s3 + $0x94] ss:$8 sps:$4 sm:$0xff]   ;;  %v1349_v8 = vld [vmem:[%s1762_s3 + $0x90] ss:$8 sps:$4 sm:$0xff]  }
  0x19   :  { %v1357_v9 = vld [vmem:[%s1762_s3 + $0x84] ss:$8 sps:$4 sm:$0xff]   ;;  %v1355_v10 = vld [vmem:[%s1762_s3 + $0x80] ss:$8 sps:$4 sm:$0xff]   ;;  %vm497_vm4 = vcmask 1046528   ;;  %vm801_vm5 = vcmask 1045504  }
  0x1a   :  { %v1128_v11 = vld [vmem:[%s1763_s2] ss:$0 sm:$0xff] }
  0x1b   :  { %303 = vmatpush1.bf16.msra.mxu0 %v1269_v17  ;;  %354 = vmatpush1.bf16.msra.mxu1 %v1296_v28 }
  0x1c   :  { %304 = vmatprep.subr.bf16.mxu0 %v1270_v18  ;;  %355 = vmatprep.subr.bf16.mxu1 %v1381_v1 }
  0x1f   :  { %305 = vmatpush1.bf16.msra.mxu0 %v1272_v20  ;;  %356 = vmatpush1.bf16.msra.mxu1 %v1297_v31 }
  0x20   :  { %314 = vmatprep.subr.bf16.mxu0 %v1273_v21  ;;  %357 = vmatprep.subr.bf16.mxu1 %v1381_v1 }
  0x23   :  { %315 = vmatpush2.bf16.msra.mxu0 %v1275_v23  ;;  %358 = vmatpush1.bf16.msra.mxu1 %v1298_v33 }
  0x24   :  { %316 = vmatprep.subr.bf16.mxu0 %v1276_v24  ;;  %367 = vmatprep.subr.bf16.mxu1 %v1381_v1 }
  0x27   :  { %317 = vmatpush2.bf16.msra.mxu0 %v1278_v26  ;;  %368 = vmatpush2.bf16.msra.mxu1 %v1299_v36 }
  0x28   :  { %318 = vmatprep.subr.bf16.mxu0 %v1279_v27  ;;  %369 = vmatprep.subr.bf16.mxu1 %v1381_v1 }
  0x2b   :  { %319 = vmatpush2.bf16.msra.mxu0 %v1281_v29  ;;  %370 = vmatpush2.bf16.msra.mxu1 %v1300_v37 }
  0x2c   :  { %320 = vmatprep.subr.bf16.mxu0 %v1282_v30  ;;  %371 = vmatprep.subr.bf16.mxu1 %v1381_v1 }
  0x2f   :  { %321 = vmatpush2.bf16.msra.mxu0 %v1284_v32  ;;  %372 = vmatpush2.bf16.msra.mxu1 %v1301_v39 }
  0x30   :  { %373 = vmatprep.subr.bf16.mxu1 %v1381_v1  ;;  %585 = vmatprep.subr.bf16.mxu0 %v1314_v47 }
  0x32   :  { %323 = vmatmul.mubr.bf16.vlgmr.msra.gmra.mxu0 %v1285_v34 }
  0x33   :  { %1125 = vmatprep.mubr.msk.bf16.mxu0 %vm283_vm0, %v1288_v35  ;;  %374 = vmatpush2.bf16.msra.mxu1 %v1302_v40 }
  0x34   :  { %723 = vmatprep.subr.bf16.mxu1 %v1305_v41  ;;  %586 = vmatpush1.bf16.msra.mxu0 %v1312_v48 }
  0x35   :  { %587 = vmatprep.subr.bf16.mxu0 %v1320_v51 }
  0x36   :  { %376 = vmatmul.mubr.bf16.vlgmr.msra.gmra.mxu1 %v1285_v34 }
  0x37   :  { %724 = vmatpush1.bf16.msra.mxu1 %v1303_v42  ;;  %1127 = vmatprep.mubr.msk.bf16.mxu1 %vm283_vm0, %v1288_v35  ;;  %v1345_v42 = vld [vmem:[%s1762_s3 + $0x170] ss:$8 sps:$4 sm:$0xff]  }
  0x38   :  { %725 = vmatprep.subr.bf16.mxu1 %v1308_v43  ;;  %588 = vmatpush1.bf16.msra.mxu0 %v1318_v52  ;;  %v1352_v52 = vld [vmem:[%s1762_s3 + $0x160] ss:$8 sps:$4 sm:$0xff]  }
  0x39   :  { %589 = vmatprep.subr.bf16.mxu0 %v1326_v55 }
  0x3a   :  { %333 = vmatmul.mubr.bf16.gmra.mxu0 %v1290_v38 }
  0x3b   :  { %617 = vmatprep.mubr.bf16.mxu0 %v1381_v1  ;;  %726 = vmatpush1.bf16.msra.mxu1 %v1306_v44 }
  0x3c   :  { %727 = vmatprep.subr.bf16.mxu1 %v1311_v45  ;;  %590 = vmatpush1.bf16.msra.mxu0 %v1324_v56 }
  0x3d   :  { %591 = vmatprep.subr.bf16.mxu0 %v1332_v59 }
  0x3e   :  { %384 = vmatmul.mubr.bf16.gmra.mxu1 %v1290_v38 }
  0x3f   :  { %728 = vmatpush1.bf16.msra.mxu1 %v1309_v46  ;;  %755 = vmatprep.mubr.bf16.mxu1 %v1381_v1 }
  0x40   :  { %729 = vmatprep.subr.bf16.mxu1 %v1317_v49  ;;  %592 = vmatpush1.bf16.msra.mxu0 %v1330_v60  ;;  %v1354_v49 = vld [vmem:[%s1762_s3 + $0x164] ss:$8 sps:$4 sm:$0xff]  }
  0x41   :  { %593 = vmatprep.subr.bf16.mxu0 %v1338_v63  ;;  %v1365_v60 = vld [vmem:[%s1762_s3 + $0x144] ss:$8 sps:$4 sm:$0xff]  }
  0x43   :  { %730 = vmatpush1.bf16.msra.mxu1 %v1315_v50 }
  0x44   :  { %731 = vmatprep.subr.bf16.mxu1 %v1323_v53  ;;  %594 = vmatpush1.bf16.msra.mxu0 %v1336_v0  ;;  %v1360_v53 = vld [vmem:[%s1762_s3 + $0x154] ss:$8 sps:$4 sm:$0xff]  }
  0x45   :  { %595 = vmatprep.subr.bf16.mxu0 %v1344_v4 }
  0x47   :  { %732 = vmatpush1.bf16.msra.mxu1 %v1321_v54 }
  0x48   :  { %733 = vmatprep.subr.bf16.mxu1 %v1329_v57  ;;  %596 = vmatpush1.bf16.msra.mxu0 %v1342_v5  ;;  %v1368_v5 = vld [vmem:[%s1762_s3 + $0x134] ss:$8 sps:$4 sm:$0xff]  }
  0x49   :  { %597 = vmatprep.subr.bf16.mxu0 %v1351_v7 }
  0x4b   :  { %734 = vmatpush1.bf16.msra.mxu1 %v1327_v58  ;;  %v1358_v58 = vld [vmem:[%s1762_s3 + $0x150] ss:$8 sps:$4 sm:$0xff]  }
  0x4c   :  { %735 = vmatprep.subr.bf16.mxu1 %v1335_v61  ;;  %598 = vmatpush1.bf16.msra.mxu0 %v1349_v8  ;;  %v1372_v8 = vld [vmem:[%s1762_s3 + $0x124] ss:$8 sps:$4 sm:$0xff]  }
  0x4d   :  { %599 = vmatprep.subr.bf16.mxu0 %v1357_v9 }
  0x4f   :  { %736 = vmatpush1.bf16.msra.mxu1 %v1333_v62 }
  0x50   :  { %737 = vmatprep.subr.bf16.mxu1 %v1341_v2  ;;  %600 = vmatpush1.bf16.msra.mxu0 %v1355_v10  ;;  %v1370_v10 = vld [vmem:[%s1762_s3 + $0x120] ss:$8 sps:$4 sm:$0xff]  }
  0x51   :  { %889 = vmatprep.subr.bf16.mxu0 %v1347_v6 }
  0x53   :  { %738 = vmatpush1.bf16.msra.mxu1 %v1339_v3  ;;  %v1363_v3 = vld [vmem:[%s1762_s3 + $0x140] ss:$8 sps:$4 sm:$0xff]  }
  0x54   :  { %1231 = vmatprep.subr.bf16.mxu1 %v1347_v6  ;;  %v1366_v6 = vld [vmem:[%s1762_s3 + $0x130] ss:$8 sps:$4 sm:$0xff]  }
  0xf2   :  { %v324_v12 = vpop.f32.mrf.mxu0 }
  0xf3   :  { %v399_v13 = vadd.f32 %v1128_v11, %v324_v12  ;;  %v1373_v12 = vld [vmem:[%s1762_s3 + $0x110] ss:$8 sps:$4 sm:$0xff]  }
  0xf4   :  { %v1654_v14 = vpop.f32.mrf.mxu0 }
  0xf5   :  { %v403_v15 = vmax.f32 %v399_v13, 0.0  ;;  %v1378_v13 = vld [vmem:[%s1762_s3 + $0x104] ss:$8 sps:$4 sm:$0xff]  }
  0xf6   :  { %v328_v16 = vpop.f32.mrf.mxu0  ;;  %v1668_v39 = vpop.f32.mrf.mxu1 }
  0xf7   :  { %v1227_v17 = vpack.c.bf16 %v403_v15, %v403_v15  ;;  %v400_v18 = vadd.f32 %v1128_v11, %v328_v16  ;;  %v1376_v16 = vld [vmem:[%s1762_s3 + $0x100] ss:$8 sps:$4 sm:$0xff]  }
  0xf8   :  { %v1656_v19 = vpop.f32.mrf.mxu0  ;;  %v379_v43 = vpop.f32.mrf.mxu1 }
  0xf9   :  { %v424_v20 = vrot.slane %v1227_v17, 7  ;;  %v404_v21 = vmax.f32 %v400_v18, 0.0  ;;  %v950_v43 = vld [vmem:[%s1764_s4] sm:$0x3] }
  0xfa   :  { %v334_v22 = vpop.f32.mrf.mxu0  ;;  %v1681_v50 = vpop.f32.mrf.mxu1 }
  0xfb   :  { %440 = vst [vmem:[#allocation2] sm:$0xe] %v424_v20  ;;  %v1228_v23 = vpack.c.bf16 %v404_v21, %v404_v21  ;;  %v401_v24 = vadd.f32 %v1128_v11, %v334_v22  ;;  %v425_v27 = vrot.slane %v424_v20, 4 }
  0xfc   :  { %v1662_v26 = vpop.f32.mrf.mxu0  ;;  %v382_v51 = vpop.f32.mrf.mxu1 }
  0xfd   :  { %v426_v28 = vrot.slane %v1228_v23, 7  ;;  %v405_v29 = vmax.f32 %v401_v24, 0.0 }
  0xfe   :  { %v338_v30 = vpop.f32.mrf.mxu0  ;;  %v1690_v55 = vpop.f32.mrf.mxu1 }
  0xff   :  { %v427_v31 = vsel %vm1658_vm3, %v425_v27, %v426_v28  ;;  %v1229_v32 = vpack.c.bf16 %v405_v29, %v405_v29  ;;  %v402_v33 = vadd.f32 %v1128_v11, %v338_v30  ;;  %v428_v34 = vrot.slane %v426_v28, 4  ;;  %v1375_v11 = vld [vmem:[%s1762_s3 + $0x114] ss:$8 sps:$4 sm:$0xff]  }
 0x100   :  { %441 = vst [vmem:[#allocation2 + $0x4] sm:$0xf] %v427_v31  ;;  %v387_v57 = vpop.f32.mrf.mxu1  ;;  %v340_v27 = vpop.f32.mrf.mxu0 }
 0x101   :  { %v429_v35 = vrot.slane %v1229_v32, 7  ;;  %v406_v36 = vmax.f32 %v402_v33, 0.0 }
 0x102   :  { %v445_v46 = vld [vmem:[#allocation2] sm:$0xf]  ;;  %v1701_v61 = vpop.f32.mrf.mxu1 }
 0x103   :  { %v430_v37 = vsel %vm1658_vm3, %v428_v34, %v429_v35  ;;  %v1230_v38 = vpack.c.bf16 %v406_v36, %v406_v36  ;;  %v431_v40 = vrot.slane %v429_v35, 4  ;;  %v465_v54 = vld [vmem:[#allocation2] sm:$0xe]  ;;  %v952_v35 = vlaneseq }
 0x104   :  { %442 = vst [vmem:[#allocation2 + $0x8] sm:$0xf] %v430_v37  ;;  %v390_v0 = vpop.f32.mrf.mxu1  ;;  %v776_v20 = vld [vmem:[#allocation2] sm:$0xc] }
 0x105   :  { %v432_v41 = vrot.slane %v1230_v38, 7  ;;  %v1739_v38 = vshrl.u32 %v952_v35, 7 }
 0x107   :  { %v433_v44 = vsel %vm1658_vm3, %v431_v40, %v432_v41  ;;  %v434_v45 = vrot.slane %v432_v41, 4  ;;  %v1675_v47 = vld [vmem:[#allocation2 + $0x4] sm:$0xf] }
 0x108   :  { %443 = vst [vmem:[#allocation2 + $0xc] sm:$0xf] %v433_v44  ;;  %v1168_v48 = vcombine.low %v445_v46, %v1675_v47  ;;  %v1149_v56 = vcombine.low %v465_v54, %v1675_v47  ;;  %v1201_v21 = vcombine.low %v776_v20, %v1675_v47  ;;  %v958_v44 = vsub.s32 1, %v1739_v38 }
 0x109   :  { %444 = vst [vmem:[#allocation2 + $0x10] sm:$0x1] %v434_v45 }
 0x10a   :  { %756 = vmatmul.mubr.bf16.vlgmr.msra.gmra.mxu1 %v1168_v48  ;;  %v498_v63 = vrot.slane %v1149_v56, 1  ;;  %v802_v22 = vrot.slane %v1201_v21, 2 }
 0x10b   :  { %1239 = vmatpush1.bf16.msra.mxu1 %v1345_v42  ;;  %765 = vmatprep.mubr.bf16.mxu1 %v1381_v1 }
 0x10c   :  { %1232 = vmatprep.subr.bf16.mxu1 %v1354_v49 }
 0x10f   :  { %1240 = vmatpush1.bf16.msra.mxu1 %v1352_v52  ;;  %v1696_v59 = vld [vmem:[#allocation2 + $0x8] sm:$0xff]  }
 0x110   :  { %1233 = vmatprep.subr.bf16.mxu1 %v1360_v53  ;;  %v499_v62 = vrot.slane %v1696_v59, 1  ;;  %v1369_v4 = vld [vmem:[#allocation2 + $0x10] ss:$0 sps:$4 sm:$0x11]  }
 0x111   :  { %v501_v7 = vrot.slane %v1369_v4, 1  ;;  %v1379_v15 = vld [vmem:[#allocation2 + $0x10] ss:$0 sps:$4 sm:$0x33]  }
 0x112   :  { %766 = vmatmul.mubr.bf16.gmra.mxu1 %v1696_v59  ;;  %v500_v2 = vsel %vm497_vm4, %v498_v63, %v499_v62  ;;  %v805_v17 = vrot.slane %v1379_v15, 2 }
 0x113   :  { %1241 = vmatpush1.bf16.msra.mxu1 %v1358_v58  ;;  %931 = vmatprep.mubr.bf16.mxu1 %v1381_v1  ;;  %v502_v9 = vsel %vm497_vm4, %v499_v62, %v501_v7 }
 0x114   :  { %618 = vmatmul.mubr.bf16.vlgmr.msra.gmra.mxu0 %v500_v2  ;;  %1234 = vmatprep.subr.bf16.mxu1 %v1365_v60 }
 0x115   :  { %890 = vmatpush1.bf16.msra.mxu0 %v1345_v42  ;;  %627 = vmatprep.mubr.bf16.mxu0 %v1381_v1  ;;  %v954_v42 = vsub.s32 0, %v1739_v38 }
 0x116   :  { %891 = vmatprep.subr.bf16.mxu0 %v1354_v49 }
 0x117   :  { %1242 = vmatpush1.bf16.msra.mxu1 %v1363_v3  ;;  %v955_v48 = vrot.slane %v950_v43, %v954_v42 }
 0x118   :  { %1235 = vmatprep.subr.bf16.mxu1 %v1368_v5 }
 0x119   :  { %892 = vmatpush1.bf16.msra.mxu0 %v1352_v52 }
 0x11a   :  { %893 = vmatprep.subr.bf16.mxu0 %v1360_v53  ;;  %v959_v53 = vrot.slane %v950_v43, %v958_v44 }
 0x11b   :  { %1243 = vmatpush1.bf16.msra.mxu1 %v1366_v6 }
 0x11c   :  { %628 = vmatmul.mubr.bf16.gmra.mxu0 %v502_v9  ;;  %1236 = vmatprep.subr.bf16.mxu1 %v1372_v8 }
 0x11d   :  { %894 = vmatpush1.bf16.msra.mxu0 %v1358_v58  ;;  %921 = vmatprep.mubr.bf16.mxu0 %v1381_v1  ;;  %v803_v1 = vrot.slane %v1696_v59, 2 }
 0x11e   :  { %895 = vmatprep.subr.bf16.mxu0 %v1365_v60 }
 0x11f   :  { %1244 = vmatpush1.bf16.msra.mxu1 %v1370_v10  ;;  %v806_v18 = vsel %vm801_vm5, %v803_v1, %v805_v17  ;;  %v804_v23 = vsel %vm801_vm5, %v802_v22, %v803_v1  ;;  %v1382_v17 = vmov 1983009808  }
 0x120   :  { %1237 = vmatprep.subr.bf16.mxu1 %v1375_v11 }
 0x121   :  { %896 = vmatpush1.bf16.msra.mxu0 %v1363_v3 }
 0x122   :  { %897 = vmatprep.subr.bf16.mxu0 %v1368_v5 }
 0x123   :  { %1245 = vmatpush1.bf16.msra.mxu1 %v1373_v12 }
 0x124   :  { %1238 = vmatprep.subr.bf16.mxu1 %v1378_v13 }
 0x125   :  { %898 = vmatpush1.bf16.msra.mxu0 %v1366_v6 }
 0x126   :  { %899 = vmatprep.subr.bf16.mxu0 %v1372_v8 }
 0x127   :  { %1246 = vmatpush1.bf16.msra.mxu1 %v1376_v16 }
 0x129   :  { %900 = vmatpush1.bf16.msra.mxu0 %v1370_v10 }
 0x12a   :  { %932 = vmatmul.mubr.bf16.vlgmr.msra.gmra.mxu1 %v806_v18  ;;  %901 = vmatprep.subr.bf16.mxu0 %v1375_v11  ;;  %v1045_v18 = vunpack.c.l.s4 %v1382_v17 }
 0x12d   :  { %902 = vmatpush1.bf16.msra.mxu0 %v1373_v12 }
 0x12e   :  { %903 = vmatprep.subr.bf16.mxu0 %v1378_v13 }
 0x131   :  { %904 = vmatpush1.bf16.msra.mxu0 %v1376_v16 }
 0x134   :  { %922 = vmatmul.mubr.bf16.vlgmr.msra.gmra.mxu0 %v804_v23 }
 0x1ca   :  { %v757_v24 = vpop.f32.mrf.mxu1 }
 0x1cc   :  { %v759_v25 = vpop.f32.mrf.mxu1 }
 0x1ce   :  { %v761_v28 = vpop.f32.mrf.mxu1 }
 0x1d0   :  { %v763_v31 = vpop.f32.mrf.mxu1 }
 0x1d2   :  { %v767_v33 = vpop.f32.mrf.mxu1 }
 0x1d4   :  { %v619_v29 = vpop.f32.mrf.mxu0  ;;  %v769_v36 = vpop.f32.mrf.mxu1 }
 0x1d5   :  { %v758_v7 = vadd.f32 %v757_v24, %v619_v29 }
 0x1d6   :  { %v621_v30 = vpop.f32.mrf.mxu0  ;;  %v771_v40 = vpop.f32.mrf.mxu1 }
 0x1d7   :  { %v760_v1 = vadd.f32 %v759_v25, %v621_v30  ;;  %v1046_v25 = vunpack.c.0.s8 %v1045_v18 }
 0x1d8   :  { %v623_v32 = vpop.f32.mrf.mxu0  ;;  %v773_v45 = vpop.f32.mrf.mxu1 }
 0x1d9   :  { %v762_v24 = vadd.f32 %v761_v28, %v623_v32 }
 0x1da   :  { %v625_v34 = vpop.f32.mrf.mxu0 }
 0x1dc   :  { %v629_v37 = vpop.f32.mrf.mxu0 }
 0x1dd   :  { %v768_v47 = vadd.f32 %v767_v33, %v629_v37  ;;  %v764_v37 = vadd.f32 %v763_v31, %v625_v34  ;;  %v1049_v31 = vsub.s32 %v1046_v25, %v1739_v38 }
 0x1de   :  { %v631_v41 = vpop.f32.mrf.mxu0 }
 0x1df   :  { %v770_v51 = vadd.f32 %v769_v36, %v631_v41 }
 0x1e0   :  { %v633_v46 = vpop.f32.mrf.mxu0 }
 0x1e1   :  { %v772_v57 = vadd.f32 %v771_v40, %v633_v46 }
 0x1e2   :  { %v635_v54 = vpop.f32.mrf.mxu0 }
 0x1e3   :  { %v774_v62 = vadd.f32 %v773_v45, %v635_v54 }
 0x1ea   :  { %v933_v49 = vpop.f32.mrf.mxu1 }
 0x1eb   :  { %v946_v52 = vadd.f32 %v933_v49, %v768_v47 }
 0x1ec   :  { %v935_v56 = vpop.f32.mrf.mxu1 }
 0x1ed   :  { %v966_v58 = vadd.f32 %v955_v48, %v946_v52  ;;  %v947_v59 = vadd.f32 %v935_v56, %v770_v51 }
 0x1ee   :  { %v937_v60 = vpop.f32.mrf.mxu1 }
 0x1ef   :  { %v974_v63 = vmax.f32 %v966_v58, 0.0  ;;  %v967_v0 = vadd.f32 %v959_v53, %v947_v59  ;;  %v948_v2 = vadd.f32 %v937_v60, %v772_v57 }
 0x1f0   :  { %v939_v3 = vpop.f32.mrf.mxu1 }
 0x1f1   :  { %v975_v4 = vmax.f32 %v967_v0, 0.0  ;;  %v968_v5 = vadd.f32 %v955_v48, %v948_v2  ;;  %v949_v6 = vadd.f32 %v939_v3, %v774_v62  ;;  %v982_v8 = vadd.f32 %v974_v63, %v1662_v26 }
 0x1f3   :  { %v983_v9 = vadd.f32 %v975_v4, %v1690_v55  ;;  %v976_v10 = vmax.f32 %v968_v5, 0.0  ;;  %v969_v11 = vadd.f32 %v959_v53, %v949_v6 }
 0x1f4   :  { %v923_v12 = vpop.f32.mrf.mxu0 }
 0x1f5   :  { %v988_v13 = vmax.f32 %v982_v8, %v983_v9  ;;  %v977_v15 = vmax.f32 %v969_v11, 0.0  ;;  %v942_v16 = vadd.f32 %v923_v12, %v758_v7  ;;  %v984_v22 = vadd.f32 %v976_v10, %v340_v27 }
 0x1f6   :  { %v925_v20 = vpop.f32.mrf.mxu0 }
 0x1f7   :  { %v996_v21 = vcombine.high %v988_v13, %v988_v13  ;;  %v985_v23 = vadd.f32 %v977_v15, %v1701_v61  ;;  %v962_v33 = vadd.f32 %v955_v48, %v942_v16  ;;  %v943_v29 = vadd.f32 %v925_v20, %v760_v1 }
 0x1f8   :  { %v927_v26 = vpop.f32.mrf.mxu0  ;;  %v1223_v35 = vrot.slane %v988_v13, 10 }
 0x1f9   :  { %v1224_v55 = vrot.slane %v996_v21, 10  ;;  %v989_v36 = vmax.f32 %v984_v22, %v985_v23  ;;  %v970_v40 = vmax.f32 %v962_v33, 0.0  ;;  %v963_v41 = vadd.f32 %v959_v53, %v943_v29 }
 0x1fa   :  { %v944_v42 = vadd.f32 %v927_v26, %v762_v24  ;;  %v929_v43 = vpop.f32.mrf.mxu0  ;;  %v1030_v61 = vmax.f32 %v988_v13, %v1223_v35 }
 0x1fb   :  { %v1031_v30 = vmax.f32 %v996_v21, %v1224_v55  ;;  %v997_v44 = vcombine.high %v989_v36, %v989_v36  ;;  %v1225_v45 = vrot.slane %v989_v36, 10  ;;  %v971_v46 = vmax.f32 %v963_v41, 0.0 }
 0x1fc   :  { %v964_v27 = vadd.f32 %v955_v48, %v944_v42  ;;  %v945_v47 = vadd.f32 %v929_v43, %v764_v37  ;;  %v978_v28 = vadd.f32 %v970_v40, %v1654_v14 }
 0x1fd   :  { %v1226_v49 = vrot.slane %v997_v44, 10  ;;  %v979_v32 = vadd.f32 %v971_v46, %v1668_v39  ;;  %v1059_v34 = vcombine.low %v1030_v61, %v1031_v30  ;;  %v1032_v54 = vmax.f32 %v989_v36, %v1225_v45 }
 0x1fe   :  { %v972_v51 = vmax.f32 %v964_v27, 0.0  ;;  %v965_v52 = vadd.f32 %v959_v53, %v945_v47 }
 0x1ff   :  { %v1033_v56 = vmax.f32 %v997_v44, %v1226_v49  ;;  %v986_v57 = vmax.f32 %v978_v28, %v979_v32  ;;  %v1067_v63 = vrot.slane %v1059_v34, %v1049_v31 }
 0x200   :  { %v973_v58 = vmax.f32 %v965_v52, 0.0  ;;  %v980_v48 = vadd.f32 %v972_v51, %v1656_v19 }
 0x201   :  { %v1060_v59 = vcombine.low %v1032_v54, %v1033_v56  ;;  %v994_v60 = vcombine.high %v986_v57, %v986_v57  ;;  %v1219_v14 = vrot.slane %v986_v57, 10 }
 0x202   :  { %v981_v62 = vadd.f32 %v973_v58, %v1681_v50 }
 0x203   :  { %v1074_v0 = vrot.slane %v1060_v59, %v1049_v31  ;;  %v1220_v2 = vrot.slane %v994_v60, 10  ;;  %v1026_v5 = vmax.f32 %v986_v57, %v1219_v14 }
 0x204   :  { %v987_v39 = vmax.f32 %v980_v48, %v981_v62 }
 0x205   :  { %v1075_v3 = vcombine.low %v1067_v63, %v1074_v0  ;;  %v1027_v53 = vmax.f32 %v994_v60, %v1220_v2 }
 0x206   :  { %v995_v4 = vcombine.high %v987_v39, %v987_v39  ;;  %v1221_v38 = vrot.slane %v987_v39, 10 }
 0x207   :  { %1079 = vst [vmem:[%s1765_s5 + $0x8] sm:$0xff] %v1075_v3  ;;  %v1042_v7 = vcombine.low %v1026_v5, %v1027_v53 }
 0x208   :  { %v1222_v6 = vrot.slane %v995_v4, 10  ;;  %v1028_v8 = vmax.f32 %v987_v39, %v1221_v38 }
 0x209   :  { %v1050_v50 = vrot.slane %v1042_v7, %v1049_v31 }
 0x20a   :  { %v1029_v19 = vmax.f32 %v995_v4, %v1222_v6 }
 0x20c   :  { %v1043_v9 = vcombine.low %v1028_v8, %v1029_v19 }
 0x20e   :  { %v1057_v10 = vrot.slane %v1043_v9, %v1049_v31 }
 0x210   :  { %v1058_v11 = vcombine.low %v1050_v50, %v1057_v10 }
 0x212   :  { %1078 = vst [vmem:[%s1765_s5] sm:$0xff] %v1058_v11 }

</bundles_post_ra>
